<compile_context>
chip_gen: v7x
topology: tpu7x:2x2x1
jax: 0.10.0
libtpu: 0.0.40
codegen_flags: <defaults>
</compile_context>

<pallas_src>
import functools

import jax
import jax.numpy as jnp
from jax.experimental import pallas as pl
from jax.experimental.pallas import tpu as pltpu

N_ITEMS = 50          # Conv1d in_channels of self.wav
ITEM_CHUNK = 8        # one sublane group per accumulation step


def drr_ave_kernel(inv_embedding_dim, user_ref, items_ref, w_ref, b_ref, out_ref):
    # Fold 1/embedding_dim into the 50-tap weight (NOT into the bias):
    #   sum_n (items[:, n, :] / E) * w[n] + b  ==  sum_n items[:, n, :] * (w[n] / E) + b
    w = (w_ref[...] * inv_embedding_dim).astype(jnp.float32)     # (N_ITEMS, 1), tiny
    bias = b_ref[0]                                              # scalar from SMEM

    user = user_ref[...].astype(jnp.float32)                     # (TB, E)

    # Conv1d(50, 1, 1) as a chunked VPU multiply + sublane partial-reduce.
    # Live state per step: (TB, E) accumulator + one (TB, <=8, E) chunk, so the
    # full (TB, 50, E) product is never materialized (no spill on v7x).
    acc = None
    for c0 in range(0, N_ITEMS, ITEM_CHUNK):
        c1 = min(c0 + ITEM_CHUNK, N_ITEMS)
        chunk = items_ref[:, c0:c1, :].astype(jnp.float32)       # (TB, <=8, E)
        part = jnp.sum(chunk * w[c0:c1][None, :, :], axis=1)     # (TB, E)
        acc = part if acc is None else acc + part
    wav = acc + bias                                             # (TB, E)

    # torch.cat([user, user*wav, wav], dim=-1), stored as (TB, 3, E): every store
    # starts at lane 0, so E need not be a multiple of 128 (DRR default E=100).
    out_ref[:, 0, :] = user.astype(out_ref.dtype)
    out_ref[:, 1, :] = (user * wav).astype(out_ref.dtype)
    out_ref[:, 2, :] = wav.astype(out_ref.dtype)


def _vmem_capacity_bytes():
    """Per-core VMEM capacity; conservative (v7x per-TC) fallback."""
    try:
        cap = getattr(pltpu.get_tpu_info(), "vmem_capacity_bytes", None)
        if cap:
            return int(cap)
    except Exception:
        pass
    return 64 * 1024 * 1024


def drr_ave_sr(user, items, weight, bias, embedding_dim, *, tb=None):
    """DRRAveSR forward.

    user:   (B, 1, E) or (B, E)
    items:  (B, 50, E)
    weight: Conv1d(50, 1, 1) weight — (1, 50, 1), (1, 50) or (50,)
    bias:   (1,)
    Returns (B, 3*E) float32 (matches the PyTorch module's default dtype).
    """
    if user.ndim == 3:
        user = user[:, 0, :]                                     # torch.squeeze(x[0], dim=1)
    B, E = user.shape
    assert items.shape == (B, N_ITEMS, E)

    # (50, 1): the 50 taps live on sublanes, so broadcasting against (TB, <=8, E)
    # item chunks needs no lane<->sublane relayout.
    w = jnp.asarray(weight, jnp.float32).reshape(N_ITEMS, 1)
    b = jnp.asarray(bias, jnp.float32).reshape(1)

    # ---- Generation-aware VMEM budget and batch-tile selection -------------
    vmem_cap = _vmem_capacity_bytes()
    # Headroom for compiler internals; never ask for more than ~100 MiB even on
    # v5e/v6e (128 MiB physical), never exceed v7x's 64 MiB per-TC.
    vmem_budget = max(32 * 1024 * 1024, min(vmem_cap - 8 * 1024 * 1024,
                                            100 * 1024 * 1024))

    if tb is None:
        e_pad = ((E + 127) // 128) * 128
        # Double-buffered per-batch-row VMEM footprint (f32, padded layouts):
        #   items (50 -> 56 sublanes) + user (1 row) + out ((3 -> 8 sublanes)).
        per_row = 2 * 4 * (56 * e_pad + e_pad + 8 * e_pad)
        tb = max(8, ((vmem_budget - 4 * 1024 * 1024) // per_row) // 8 * 8)
        tb = min(tb, 1024)                 # step overhead already amortized here
        if B >= 16:
            # >=2 grid steps so the "parallel" B axis shards across both
            # TensorCores on v7x (free on single-TC v5e/v6e).
            tb = min(tb, max(8, (B // 2 // 8) * 8))
    tb = min(tb, B)
    if tb != B:
        tb = max(8, (tb // 8) * 8)         # (8, 128) block-shape rule on user block
    grid = (pl.cdiv(B, tb),)

    kernel = functools.partial(drr_ave_kernel, 1.0 / float(embedding_dim))

    in_bytes = (B * N_ITEMS * E * items.dtype.itemsize
                + B * E * user.dtype.itemsize)
    out_bytes = B * 3 * E * 4
    cost = pl.CostEstimate(
        flops=2 * B * N_ITEMS * E + 2 * B * E,
        transcendentals=0,
        bytes_accessed=in_bytes + out_bytes,
    )

    out3 = pl.pallas_call(
        kernel,
        out_shape=jax.ShapeDtypeStruct((B, 3, E), jnp.float32),
        grid=grid,
        in_specs=[
            pl.BlockSpec((tb, E), lambda i: (i, 0)),               # user   (TB, E)
            pl.BlockSpec((tb, N_ITEMS, E), lambda i: (i, 0, 0)),   # items  (TB, 50, E)
            pl.BlockSpec((N_ITEMS, 1), lambda i: (0, 0)),          # weight (resident)
            pl.BlockSpec((1,), lambda i: (0,),
                         memory_space=pltpu.MemorySpace.SMEM),     # bias   scalar
        ],
        out_specs=pl.BlockSpec((tb, 3, E), lambda i: (i, 0, 0)),
        compiler_params=pltpu.CompilerParams(
            dimension_semantics=("parallel",),
            vmem_limit_bytes=int(vmem_budget),
        ),
        cost_estimate=cost,
    )(user, items, w, b)

    # Contiguous (B, 3, E) -> (B, 3E): free metadata reshape, gives the exact
    # torch.cat([user, user*wav, wav], dim=-1) layout.
    return out3.reshape(B, 3 * E)


if __name__ == "__main__":
    key = jax.random.PRNGKey(0)
    # Small shapes consistent with the module: 50 items fixed by Conv1d(50,1,1),
    # embedding_dim=100 (DRR's typical value, exercises the E % 128 != 0 path),
    # B=16 gives a 2-step tiled grid.
    B, E = 16, 100
    k1, k2, k3, k4 = jax.random.split(key, 4)

    # x[0]: (B, 1, E), x[1]: (B, 50, E), float32 (PyTorch default)
    user = jax.random.normal(k1, (B, 1, E), dtype=jnp.float32)
    items = jax.random.normal(k2, (B, N_ITEMS, E), dtype=jnp.float32)

    # Conv1d(50, 1, 1) params in PyTorch layout: weight (1, 50, 1), bias (1,)
    weight = (jax.random.uniform(k3, (1, N_ITEMS, 1), dtype=jnp.float32) - 0.5) * 0.2
    bias = (jax.random.uniform(k4, (1,), dtype=jnp.float32) - 0.5) * 0.2

    out = drr_ave_sr(user, items, weight, bias, embedding_dim=E)
    out = jax.block_until_ready(out)

    # Pure-JAX reference
    items_eb = items / E
    wav_ref = jnp.einsum("bne,n->be", items_eb, weight.reshape(N_ITEMS)) + bias[0]
    u = user[:, 0, :]
    ref = jnp.concatenate([u, u * wav_ref, wav_ref], axis=-1)

    assert out.shape == (B, 3 * E)
    assert jnp.allclose(out, ref, atol=1e-5, rtol=1e-5), float(jnp.max(jnp.abs(out - ref)))

    print("KERNEL_OK")
</pallas_src>

<mosaic_0001>
module attributes {stable_mosaic.version = 11 : i64} {
  func.func @drr_ave_kernel(%arg0: i32, %arg1: memref<8x100xf32, #tpu.memory_space<vmem>>, %arg2: memref<8x50x100xf32, #tpu.memory_space<vmem>>, %arg3: memref<50x1xf32, #tpu.memory_space<vmem>>, %arg4: memref<1xf32, #tpu.memory_space<smem>>, %arg5: memref<8x3x100xf32, #tpu.memory_space<vmem>>) attributes {dimension_semantics = [#tpu.dimension_semantics<parallel>], iteration_bounds = array<i64: 2>, scalar_prefetch = 0 : i64, scratch_operands = 0 : i64, tpu.core_type = #tpu.core_type<tc>, window_params = [{transform_indices = @transform_0, window_bounds = array<i64: 8, 100>}, {transform_indices = @transform_1, window_bounds = array<i64: 8, 50, 100>}, {pipeline_mode = #tpu.pipeline_mode<synchronous>, transform_indices = @transform_2, window_bounds = array<i64: 50, 1>}, {transform_indices = @transform_3, window_bounds = array<i64: 1>}, {transform_indices = @transform_4, window_bounds = array<i64: 8, 3, 100>}]} {
    %c0 = arith.constant 0 : index
    %c0_0 = arith.constant 0 : index
    %0 = vector.load %arg3[%c0, %c0_0] : memref<50x1xf32, #tpu.memory_space<vmem>>, vector<50x1xf32>
    %cst = arith.constant 0.00999999977 : f32
    %1 = vector.broadcast %cst : f32 to vector<50x1xf32>
    %2 = arith.mulf %0, %1 : vector<50x1xf32>
    %c0_1 = arith.constant 0 : index
    %3 = memref.load %arg4[%c0_1] : memref<1xf32, #tpu.memory_space<smem>>
    %c0_2 = arith.constant 0 : index
    %c0_3 = arith.constant 0 : index
    %4 = vector.load %arg1[%c0_2, %c0_3] : memref<8x100xf32, #tpu.memory_space<vmem>>, vector<8x100xf32>
    %c0_4 = arith.constant 0 : index
    %c0_5 = arith.constant 0 : index
    %c0_6 = arith.constant 0 : index
    %5 = vector.load %arg2[%c0_4, %c0_5, %c0_6] : memref<8x50x100xf32, #tpu.memory_space<vmem>>, vector<8x8x100xf32>
    %6 = vector.extract_strided_slice %2 {offsets = [0, 0], sizes = [8, 1], strides = [1, 1]} : vector<50x1xf32> to vector<8x1xf32>
    %7 = vector.shape_cast %6 : vector<8x1xf32> to vector<1x8x1xf32>
    %8 = vector.broadcast %7 : vector<1x8x1xf32> to vector<8x8x100xf32>
    %9 = arith.mulf %5, %8 : vector<8x8x100xf32>
    %cst_7 = arith.constant dense<0.000000e+00> : vector<8x100xf32>
    %10 = vector.multi_reduction <add>, %9, %cst_7 [1] : vector<8x8x100xf32> to vector<8x100xf32>
    %c0_8 = arith.constant 0 : index
    %c8 = arith.constant 8 : index
    %c0_9 = arith.constant 0 : index
    %11 = vector.load %arg2[%c0_8, %c8, %c0_9] : memref<8x50x100xf32, #tpu.memory_space<vmem>>, vector<8x8x100xf32>
    %12 = vector.extract_strided_slice %2 {offsets = [8, 0], sizes = [8, 1], strides = [1, 1]} : vector<50x1xf32> to vector<8x1xf32>
    %13 = vector.shape_cast %12 : vector<8x1xf32> to vector<1x8x1xf32>
    %14 = vector.broadcast %13 : vector<1x8x1xf32> to vector<8x8x100xf32>
    %15 = arith.mulf %11, %14 : vector<8x8x100xf32>
    %cst_10 = arith.constant dense<0.000000e+00> : vector<8x100xf32>
    %16 = vector.multi_reduction <add>, %15, %cst_10 [1] : vector<8x8x100xf32> to vector<8x100xf32>
    %17 = arith.addf %10, %16 : vector<8x100xf32>
    %c0_11 = arith.constant 0 : index
    %c16 = arith.constant 16 : index
    %c0_12 = arith.constant 0 : index
    %18 = vector.load %arg2[%c0_11, %c16, %c0_12] : memref<8x50x100xf32, #tpu.memory_space<vmem>>, vector<8x8x100xf32>
    %19 = vector.extract_strided_slice %2 {offsets = [16, 0], sizes = [8, 1], strides = [1, 1]} : vector<50x1xf32> to vector<8x1xf32>
    %20 = vector.shape_cast %19 : vector<8x1xf32> to vector<1x8x1xf32>
    %21 = vector.broadcast %20 : vector<1x8x1xf32> to vector<8x8x100xf32>
    %22 = arith.mulf %18, %21 : vector<8x8x100xf32>
    %cst_13 = arith.constant dense<0.000000e+00> : vector<8x100xf32>
    %23 = vector.multi_reduction <add>, %22, %cst_13 [1] : vector<8x8x100xf32> to vector<8x100xf32>
    %24 = arith.addf %17, %23 : vector<8x100xf32>
    %c0_14 = arith.constant 0 : index
    %c24 = arith.constant 24 : index
    %c0_15 = arith.constant 0 : index
    %25 = vector.load %arg2[%c0_14, %c24, %c0_15] : memref<8x50x100xf32, #tpu.memory_space<vmem>>, vector<8x8x100xf32>
    %26 = vector.extract_strided_slice %2 {offsets = [24, 0], sizes = [8, 1], strides = [1, 1]} : vector<50x1xf32> to vector<8x1xf32>
    %27 = vector.shape_cast %26 : vector<8x1xf32> to vector<1x8x1xf32>
    %28 = vector.broadcast %27 : vector<1x8x1xf32> to vector<8x8x100xf32>
    %29 = arith.mulf %25, %28 : vector<8x8x100xf32>
    %cst_16 = arith.constant dense<0.000000e+00> : vector<8x100xf32>
    %30 = vector.multi_reduction <add>, %29, %cst_16 [1] : vector<8x8x100xf32> to vector<8x100xf32>
    %31 = arith.addf %24, %30 : vector<8x100xf32>
    %c0_17 = arith.constant 0 : index
    %c32 = arith.constant 32 : index
    %c0_18 = arith.constant 0 : index
    %32 = vector.load %arg2[%c0_17, %c32, %c0_18] : memref<8x50x100xf32, #tpu.memory_space<vmem>>, vector<8x8x100xf32>
    %33 = vector.extract_strided_slice %2 {offsets = [32, 0], sizes = [8, 1], strides = [1, 1]} : vector<50x1xf32> to vector<8x1xf32>
    %34 = vector.shape_cast %33 : vector<8x1xf32> to vector<1x8x1xf32>
    %35 = vector.broadcast %34 : vector<1x8x1xf32> to vector<8x8x100xf32>
    %36 = arith.mulf %32, %35 : vector<8x8x100xf32>
    %cst_19 = arith.constant dense<0.000000e+00> : vector<8x100xf32>
    %37 = vector.multi_reduction <add>, %36, %cst_19 [1] : vector<8x8x100xf32> to vector<8x100xf32>
    %38 = arith.addf %31, %37 : vector<8x100xf32>
    %c0_20 = arith.constant 0 : index
    %c40 = arith.constant 40 : index
    %c0_21 = arith.constant 0 : index
    %39 = vector.load %arg2[%c0_20, %c40, %c0_21] : memref<8x50x100xf32, #tpu.memory_space<vmem>>, vector<8x8x100xf32>
    %40 = vector.extract_strided_slice %2 {offsets = [40, 0], sizes = [8, 1], strides = [1, 1]} : vector<50x1xf32> to vector<8x1xf32>
    %41 = vector.shape_cast %40 : vector<8x1xf32> to vector<1x8x1xf32>
    %42 = vector.broadcast %41 : vector<1x8x1xf32> to vector<8x8x100xf32>
    %43 = arith.mulf %39, %42 : vector<8x8x100xf32>
    %cst_22 = arith.constant dense<0.000000e+00> : vector<8x100xf32>
    %44 = vector.multi_reduction <add>, %43, %cst_22 [1] : vector<8x8x100xf32> to vector<8x100xf32>
    %45 = arith.addf %38, %44 : vector<8x100xf32>
    %c0_23 = arith.constant 0 : index
    %c48 = arith.constant 48 : index
    %c0_24 = arith.constant 0 : index
    %46 = vector.load %arg2[%c0_23, %c48, %c0_24] : memref<8x50x100xf32, #tpu.memory_space<vmem>>, vector<8x2x100xf32>
    %47 = vector.extract_strided_slice %2 {offsets = [48, 0], sizes = [2, 1], strides = [1, 1]} : vector<50x1xf32> to vector<2x1xf32>
    %48 = vector.shape_cast %47 : vector<2x1xf32> to vector<1x2x1xf32>
    %49 = vector.broadcast %48 : vector<1x2x1xf32> to vector<8x2x100xf32>
    %50 = arith.mulf %46, %49 : vector<8x2x100xf32>
    %cst_25 = arith.constant dense<0.000000e+00> : vector<8x100xf32>
    %51 = vector.multi_reduction <add>, %50, %cst_25 [1] : vector<8x2x100xf32> to vector<8x100xf32>
    %52 = arith.addf %45, %51 : vector<8x100xf32>
    %53 = vector.broadcast %3 : f32 to vector<8x100xf32>
    %54 = arith.addf %52, %53 : vector<8x100xf32>
    %c0_26 = arith.constant 0 : index
    %c0_27 = arith.constant 0 : index
    %c0_28 = arith.constant 0 : index
    %55 = vector.load %arg5[%c0_26, %c0_27, %c0_28] : memref<8x3x100xf32, #tpu.memory_space<vmem>>, vector<8x1x100xf32>
    %56 = vector.shape_cast %55 : vector<8x1x100xf32> to vector<8x100xf32>
    %57 = vector.shape_cast %4 : vector<8x100xf32> to vector<8x1x100xf32>
    tpu.vector_store %arg5[%c0_26, %c0_27, %c0_28], %57 {strides = array<i32>} : memref<8x3x100xf32, #tpu.memory_space<vmem>>, vector<8x1x100xf32>,
    %58 = arith.mulf %4, %54 : vector<8x100xf32>
    %c0_29 = arith.constant 0 : index
    %c1 = arith.constant 1 : index
    %c0_30 = arith.constant 0 : index
    %59 = vector.load %arg5[%c0_29, %c1, %c0_30] : memref<8x3x100xf32, #tpu.memory_space<vmem>>, vector<8x1x100xf32>
    %60 = vector.shape_cast %59 : vector<8x1x100xf32> to vector<8x100xf32>
    %61 = vector.shape_cast %58 : vector<8x100xf32> to vector<8x1x100xf32>
    tpu.vector_store %arg5[%c0_29, %c1, %c0_30], %61 {strides = array<i32>} : memref<8x3x100xf32, #tpu.memory_space<vmem>>, vector<8x1x100xf32>,
    %c0_31 = arith.constant 0 : index
    %c2 = arith.constant 2 : index
    %c0_32 = arith.constant 0 : index
    %62 = vector.load %arg5[%c0_31, %c2, %c0_32] : memref<8x3x100xf32, #tpu.memory_space<vmem>>, vector<8x1x100xf32>
    %63 = vector.shape_cast %62 : vector<8x1x100xf32> to vector<8x100xf32>
    %64 = vector.shape_cast %54 : vector<8x100xf32> to vector<8x1x100xf32>
    tpu.vector_store %arg5[%c0_31, %c2, %c0_32], %64 {strides = array<i32>} : memref<8x3x100xf32, #tpu.memory_space<vmem>>, vector<8x1x100xf32>,
    return
  }
  func.func @transform_0(%arg0: i32) -> (i32, i32) {
    %c0_i32 = arith.constant 0 : i32
    %c0_i32_0 = arith.constant 0 : i32
    return %arg0, %c0_i32 : i32, i32
  }
  func.func @transform_1(%arg0: i32) -> (i32, i32, i32) {
    %c0_i32 = arith.constant 0 : i32
    %c0_i32_0 = arith.constant 0 : i32
    %c0_i32_1 = arith.constant 0 : i32
    return %arg0, %c0_i32, %c0_i32_0 : i32, i32, i32
  }
  func.func @transform_2(%arg0: i32) -> (i32, i32) {
    %c0_i32 = arith.constant 0 : i32
    %c0_i32_0 = arith.constant 0 : i32
    %c0_i32_1 = arith.constant 0 : i32
    return %c0_i32, %c0_i32_0 : i32, i32
  }
  func.func @transform_3(%arg0: i32) -> i32 {
    %c0_i32 = arith.constant 0 : i32
    %c0_i32_0 = arith.constant 0 : i32
    return %c0_i32 : i32
  }
  func.func @transform_4(%arg0: i32) -> (i32, i32, i32) {
    %c0_i32 = arith.constant 0 : i32
    %c0_i32_0 = arith.constant 0 : i32
    %c0_i32_1 = arith.constant 0 : i32
    return %arg0, %c0_i32, %c0_i32_0 : i32, i32, i32
  }
}

</mosaic_0001>

<bundles_post_ra>
// kernel: tpu_custom_call.1
= control target key start
LH: loop header
LB: loop body
LE: loop exit
PB: predicated region body
PF: predicated region fallthrough
CT: control target
= control target key end

     0   :  { %s1134_s17 = smov 0   ;;  %s1539_s0 = inlined_call_operand.vmem [shape: f32[16,100], index: 0, kind: input, shape index: {}]   ;;  %s1540_s1 = inlined_call_operand.vmem [shape: f32[16,50,100], index: 1, kind: input, shape index: {}]   ;;  %s1541_s2 = inlined_call_operand.vmem [shape: f32[50,1], index: 2, kind: input, shape index: {}]   ;;  %s1542_s3 = inlined_call_operand.<no memory space> [shape: f32[1], index: 3, kind: input, shape index: {}]   ;;  %s1543_s4 = inlined_call_operand.vmem [shape: f32[16,3,100], index: 4, kind: output, shape index: {}]  }
   0x1   :  { %9 = sst [smem:[#allocation2]] %s1542_s3 }
   0x2 LB: > { %s1140_s18 = sadd.s32 4294967295, %s1102_s17   ;;  %p1073_p0 = scmp.ge.s32.totalorder %s1102_s17, 1  ;;  %s1102_s17 = sphi %s1134_s17, %s15_s17  }
   0x3   : > { %p174_p1 = scmp.lt.s32.totalorder %s1102_s17, 3 }
   0x5   : > { %p175_p2 = pnand %p1073_p0, %p174_p1 }
   0x6   : > { %v224_v0 = vld [vmem:[%s1541_s2 + $0x10] sm:$0xff] (!%p175_p2)  ;;  %v222_v1 = vld [vmem:[%s1541_s2] sm:$0xff] (!%p175_p2)  ;;  %v225_v2 = vld [vmem:[%s1541_s2 + $0x18] sm:$0xff] (!%p175_p2)  ;;  %v1104_v3 = vmov (!%p175_p2), 0   ;;  %s1075_s6 = sshll.u32 (!%p175_p2), %s1140_s18, 3  ;;  %p205_p4 = scmp.lt.s32.totalorder (!%p175_p2), %s1140_s18, 1  ;;  %v841_v17 = vlaneseq (!%p175_p2) }
   0x7   : > { %178 = sbr.rel (%p175_p2) target bundleno = 285 (0x11d), region = 36  ;;  %1093 = vset.pattern.permute.xlu1 (!%p175_p2), %v1104_v3  ;;  %1092 = vset.pattern.permute.xlu0 (!%p175_p2), %v1104_v3  ;;  %v231_v4 = vmul.f32 (!%p175_p2), 0.01, %v224_v0  ;;  %v229_v5 = vmul.f32 (!%p175_p2), 0.01, %v222_v1  ;;  %v223_v6 = vld [vmem:[%s1541_s2 + $0x8] sm:$0xff] (!%p175_p2) }
   0x8   : > { %v232_v7 = vmul.f32 (!%p175_p2), 0.01, %v225_v2  ;;  %v230_v8 = vmul.f32 (!%p175_p2), 0.01, %v223_v6  ;;  %v227_v9 = vld [vmem:[%s1541_s2 + $0x28] sm:$0xff] (!%p175_p2)  ;;  %v226_v10 = vld [vmem:[%s1541_s2 + $0x20] sm:$0xff] (!%p175_p2) }
   0x9   : > { %411 = vperm.xlu1 (!%p175_p2), %1093, %v231_v4   ;;  %248 = vperm.xlu0 (!%p175_p2), %1092, %v229_v5   ;;  %v234_v11 = vmul.f32 (!%p175_p2), 0.01, %v227_v9  ;;  %v233_v12 = vmul.f32 (!%p175_p2), 0.01, %v226_v10  ;;  %v228_v13 = vld [vmem:[%s1541_s2 + $0x30] sm:$0x3] (!%p175_p2) }
   0xa   : > { %v235_v14 = vmul.f32 (!%p175_p2), 0.01, %v228_v13  ;;  %p210_p3 = scmp.lt.s32.totalorder (!%p175_p2), %s1075_s6, 15  ;;  %v1105_v15 = vmov (!%p175_p2), 1966171168   ;;  %s236_s8 = sld [smem:[#allocation2]] (!%p175_p2) }
   0xb   : > { %v839_v16 = vunpack.c.l.s4 (!%p175_p2), %v1105_v15  ;;  %v842_v19 = vshrl.u32 (!%p175_p2), %v841_v17, 7  ;;  %vm259_vm0 = vcmask (!%p175_p2), 818176   ;;  %vm762_vm1 = vcmask (!%p175_p2), 812032  }
   0xc   : > { %vm894_vm2 = vcmask (!%p175_p2), 811008   ;;  %vm911_vm3 = vcmask (!%p175_p2), 1041409   ;;  %vm913_vm4 = vcmask (!%p175_p2), 1042434   ;;  %vm915_vm5 = vcmask (!%p175_p2), 1043459  }
   0xd   : > { %496 = vperm.xlu1 (!%p175_p2), %1093, %v232_v7   ;;  %326 = vperm.xlu0 (!%p175_p2), %1092, %v230_v8   ;;  %v840_v18 = vunpack.c.0.s8 (!%p175_p2), %v839_v16  ;;  %vm917_vm6 = vcmask (!%p175_p2), 1044484   ;;  %vm919_vm7 = vcmask (!%p175_p2), 1045509   ;;  %vm921_vm8 = vcmask (!%p175_p2), 1046534  }
   0xe   : > { %s1546_s6 = smov (!%p210_p3, %s1075_s6), 15  ;;  %s1548_s18 = smov (!%p205_p4, %s1140_s18), 1  ;;  %vm923_vm9 = vcmask 1047559  }
   0xf   : > { %s1081_s7 = smul.u32 56, %s1546_s6  ;;  %s1074_s9 = sshll.u32 %s1548_s18, 3  ;;  %v1187_v26 = vsub.s32 %v840_v18, %v842_v19 }
  0x10   : > { %s1179_s15 = scalar_lea.vmem %s1539_s0, %s1074_s9  ;;  %v1194_v31 = vstv %s236_s8  ;;  %s1078_s16 = sshll.u32 %s1546_s6, 2 }
  0x11   : > { %666 = vperm.xlu1 %1093, %v234_v11   ;;  %581 = vperm.xlu0 %1092, %v233_v12   ;;  %s1174_s12 = scalar_lea.vmem %s1540_s1, %s1081_s7  ;;  %v1192_v29 = vld [vmem:[%s1179_s15] sm:$0xff]  ;;  %s1450_s20 = scalar_lea.vmem %s1543_s4, %s1078_s16 }
  0x12   : > { %v401_v20 = vld [vmem:[%s1174_s12 + $0x10] sm:$0xff]  ;;  %v402_v21 = vld [vmem:[%s1174_s12 + $0x48] sm:$0xff]  ;;  %v403_v22 = vld [vmem:[%s1174_s12 + $0x80] sm:$0xff]  ;;  %v1200_v33 = vrot.slane %v1192_v29, %v1187_v26 }
  0x13   : > { %v404_v23 = vld [vmem:[%s1174_s12 + $0xb8] sm:$0xff]  ;;  %v405_v24 = vld [vmem:[%s1174_s12 + $0xf0] sm:$0xff]  ;;  %v406_v25 = vld [vmem:[%s1174_s12 + $0x128] sm:$0xff] }
  0x14   : > { %v407_v27 = vld [vmem:[%s1174_s12 + $0x160] sm:$0xff]  ;;  %v408_v28 = vld [vmem:[%s1174_s12 + $0x198] sm:$0xff] }
  0x15   : > { %751 = vperm.xlu0 %1092, %v235_v14   ;;  %v238_v18 = vld [vmem:[%s1174_s12] sm:$0xff] }
  0x88   : > { %v412_v30 = vpop.permute.xlu1 %411 }
  0x89   : > { %v414_v34 = vmul.f32 %v412_v30, %v401_v20  ;;  %v415_v35 = vmul.f32 %v412_v30, %v402_v21  ;;  %v416_v36 = vmul.f32 %v412_v30, %v403_v22  ;;  %v417_v37 = vmul.f32 %v412_v30, %v404_v23  ;;  %v249_v23 = vpop.permute.xlu0 %248 }
  0x8a   : > { %v418_v38 = vmul.f32 %v412_v30, %v405_v24  ;;  %v419_v39 = vmul.f32 %v412_v30, %v406_v25  ;;  %v420_v40 = vmul.f32 %v412_v30, %v407_v27  ;;  %v421_v41 = vmul.f32 %v412_v30, %v408_v28  ;;  %v239_v24 = vld [vmem:[%s1174_s12 + $0x38] sm:$0xff]  ;;  %v240_v25 = vld [vmem:[%s1174_s12 + $0x70] sm:$0xff]  ;;  %v241_v27 = vld [vmem:[%s1174_s12 + $0xa8] sm:$0xff] }
  0x8b   : > { %v422_v42 = vsel %vm259_vm0, %v414_v34, 0.0  ;;  %v429_v43 = vsel %vm259_vm0, %v415_v35, 0.0  ;;  %v436_v44 = vsel %vm259_vm0, %v416_v36, 0.0  ;;  %v443_v45 = vsel %vm259_vm0, %v417_v37, 0.0  ;;  %v242_v36 = vld [vmem:[%s1174_s12 + $0xe0] sm:$0xff]  ;;  %v243_v37 = vld [vmem:[%s1174_s12 + $0x118] sm:$0xff] }
  0x8c   : > { %v423_v46 = vrot.slane %v422_v42, 4  ;;  %v430_v47 = vrot.slane %v429_v43, 4  ;;  %v437_v48 = vrot.slane %v436_v44, 4  ;;  %v444_v49 = vrot.slane %v443_v45, 4 }
  0x8d   : > { %v450_v50 = vsel %vm259_vm0, %v418_v38, 0.0  ;;  %v457_v51 = vsel %vm259_vm0, %v419_v39, 0.0  ;;  %v464_v52 = vsel %vm259_vm0, %v420_v40, 0.0  ;;  %v471_v53 = vsel %vm259_vm0, %v421_v41, 0.0 }
  0x8e   : > { %v424_v54 = vadd.f32 %v423_v46, %v422_v42  ;;  %v431_v55 = vadd.f32 %v430_v47, %v429_v43  ;;  %v438_v56 = vadd.f32 %v437_v48, %v436_v44  ;;  %v445_v57 = vadd.f32 %v444_v49, %v443_v45  ;;  %v244_v42 = vld [vmem:[%s1174_s12 + $0x150] sm:$0xff]  ;;  %v245_v43 = vld [vmem:[%s1174_s12 + $0x188] sm:$0xff] }
  0x8f   : > { %v451_v58 = vrot.slane %v450_v50, 4  ;;  %v458_v59 = vrot.slane %v457_v51, 4  ;;  %v465_v60 = vrot.slane %v464_v52, 4  ;;  %v472_v61 = vrot.slane %v471_v53, 4 }
  0x90   : > { %v425_v62 = vrot.slane %v424_v54, 2  ;;  %v432_v63 = vrot.slane %v431_v55, 2  ;;  %v439_v0 = vrot.slane %v438_v56, 2  ;;  %v446_v1 = vrot.slane %v445_v57, 2 }
  0x91   : > { %v452_v2 = vadd.f32 %v451_v58, %v450_v50  ;;  %v459_v3 = vadd.f32 %v458_v59, %v457_v51  ;;  %v466_v4 = vadd.f32 %v465_v60, %v464_v52  ;;  %v473_v5 = vadd.f32 %v472_v61, %v471_v53 }
  0x92   : > { %v426_v6 = vadd.f32 %v425_v62, %v424_v54  ;;  %v433_v7 = vadd.f32 %v432_v63, %v431_v55  ;;  %v440_v8 = vadd.f32 %v439_v0, %v438_v56  ;;  %v447_v9 = vadd.f32 %v446_v1, %v445_v57 }
  0x93   : > { %v453_v10 = vrot.slane %v452_v2, 2  ;;  %v460_v11 = vrot.slane %v459_v3, 2  ;;  %v467_v12 = vrot.slane %v466_v4, 2  ;;  %v474_v13 = vrot.slane %v473_v5, 2 }
  0x94   : > { %v427_v14 = vrot.slane %v426_v6, 1  ;;  %v434_v15 = vrot.slane %v433_v7, 1  ;;  %v441_v16 = vrot.slane %v440_v8, 1  ;;  %v448_v17 = vrot.slane %v447_v9, 1 }
  0x95   : > { %v454_v19 = vadd.f32 %v453_v10, %v452_v2  ;;  %v461_v20 = vadd.f32 %v460_v11, %v459_v3  ;;  %v468_v21 = vadd.f32 %v467_v12, %v466_v4  ;;  %v475_v22 = vadd.f32 %v474_v13, %v473_v5 }
  0x96   : > { %v1214_v28 = vadd.f32 %v427_v14, %v426_v6  ;;  %v1216_v30 = vadd.f32 %v434_v15, %v433_v7  ;;  %v1218_v34 = vadd.f32 %v441_v16, %v440_v8  ;;  %v1220_v35 = vadd.f32 %v448_v17, %v447_v9 }
  0x97   : > { %v455_v38 = vrot.slane %v454_v19, 1  ;;  %v462_v39 = vrot.slane %v461_v20, 1  ;;  %v469_v40 = vrot.slane %v468_v21, 1  ;;  %v476_v41 = vrot.slane %v475_v22, 1 }
  0x98   : > { %v251_v44 = vmul.f32 %v249_v23, %v238_v18  ;;  %v252_v45 = vmul.f32 %v249_v23, %v239_v24  ;;  %v253_v46 = vmul.f32 %v249_v23, %v240_v25  ;;  %v254_v47 = vmul.f32 %v249_v23, %v241_v27 }
  0x99   : > { %v1226_v48 = vadd.f32 %v455_v38, %v454_v19  ;;  %v1228_v49 = vadd.f32 %v462_v39, %v461_v20  ;;  %v1230_v50 = vadd.f32 %v469_v40, %v468_v21  ;;  %v1232_v51 = vadd.f32 %v476_v41, %v475_v22  ;;  %v486_v41 = vld [vmem:[%s1174_s12 + $0x18] sm:$0xff] }
  0x9a   : > { %v255_v52 = vmul.f32 %v249_v23, %v242_v36  ;;  %v256_v53 = vmul.f32 %v249_v23, %v243_v37  ;;  %v257_v54 = vmul.f32 %v249_v23, %v244_v42  ;;  %v258_v55 = vmul.f32 %v249_v23, %v245_v43 }
  0x9b   : > { %v260_v56 = vsel %vm259_vm0, %v251_v44, 0.0  ;;  %v267_v57 = vsel %vm259_vm0, %v252_v45, 0.0  ;;  %v274_v58 = vsel %vm259_vm0, %v253_v46, 0.0  ;;  %v281_v59 = vsel %vm259_vm0, %v254_v47, 0.0  ;;  %v497_v46 = vpop.permute.xlu1 %496  ;;  %v487_v47 = vld [vmem:[%s1174_s12 + $0x50] sm:$0xff] }
  0x9c   : > { %v261_v60 = vrot.slane %v260_v56, 4  ;;  %v268_v61 = vrot.slane %v267_v57, 4  ;;  %v275_v62 = vrot.slane %v274_v58, 4  ;;  %v282_v63 = vrot.slane %v281_v59, 4 }
  0x9d   : > { %v288_v0 = vsel %vm259_vm0, %v255_v52, 0.0  ;;  %v295_v1 = vsel %vm259_vm0, %v256_v53, 0.0  ;;  %v302_v2 = vsel %vm259_vm0, %v257_v54, 0.0  ;;  %v309_v3 = vsel %vm259_vm0, %v258_v55, 0.0  ;;  %v488_v52 = vld [vmem:[%s1174_s12 + $0x88] sm:$0xff]  ;;  %v489_v53 = vld [vmem:[%s1174_s12 + $0xc0] sm:$0xff] }
  0x9e   : > { %v262_v4 = vadd.f32 %v261_v60, %v260_v56  ;;  %v269_v5 = vadd.f32 %v268_v61, %v267_v57  ;;  %v276_v6 = vadd.f32 %v275_v62, %v274_v58  ;;  %v283_v7 = vadd.f32 %v282_v63, %v281_v59  ;;  %v490_v58 = vld [vmem:[%s1174_s12 + $0xf8] sm:$0xff]  ;;  %v491_v59 = vld [vmem:[%s1174_s12 + $0x130] sm:$0xff] }
  0x9f   : > { %v289_v8 = vrot.slane %v288_v0, 4  ;;  %v296_v9 = vrot.slane %v295_v1, 4  ;;  %v303_v10 = vrot.slane %v302_v2, 4  ;;  %v310_v11 = vrot.slane %v309_v3, 4 }
  0xa0   : > { %v263_v12 = vrot.slane %v262_v4, 2  ;;  %v270_v13 = vrot.slane %v269_v5, 2  ;;  %v277_v14 = vrot.slane %v276_v6, 2  ;;  %v284_v15 = vrot.slane %v283_v7, 2 }
  0xa1   : > { %v290_v16 = vadd.f32 %v289_v8, %v288_v0  ;;  %v297_v17 = vadd.f32 %v296_v9, %v295_v1  ;;  %v304_v18 = vadd.f32 %v303_v10, %v302_v2  ;;  %v311_v19 = vadd.f32 %v310_v11, %v309_v3  ;;  %v492_v0 = vld [vmem:[%s1174_s12 + $0x168] sm:$0xff]  ;;  %v493_v1 = vld [vmem:[%s1174_s12 + $0x1a0] sm:$0xff] }
  0xa2   : > { %v264_v20 = vadd.f32 %v263_v12, %v262_v4  ;;  %v271_v21 = vadd.f32 %v270_v13, %v269_v5  ;;  %v278_v22 = vadd.f32 %v277_v14, %v276_v6  ;;  %v285_v23 = vadd.f32 %v284_v15, %v283_v7 }
  0xa3   : > { %v291_v24 = vrot.slane %v290_v16, 2  ;;  %v298_v25 = vrot.slane %v297_v17, 2  ;;  %v305_v27 = vrot.slane %v304_v18, 2  ;;  %v312_v36 = vrot.slane %v311_v19, 2 }
  0xa4   : > { %v265_v37 = vrot.slane %v264_v20, 1  ;;  %v272_v38 = vrot.slane %v271_v21, 1  ;;  %v279_v39 = vrot.slane %v278_v22, 1  ;;  %v286_v40 = vrot.slane %v285_v23, 1 }
  0xa5   : > { %v292_v42 = vadd.f32 %v291_v24, %v290_v16  ;;  %v299_v43 = vadd.f32 %v298_v25, %v297_v17  ;;  %v306_v44 = vadd.f32 %v305_v27, %v304_v18  ;;  %v313_v45 = vadd.f32 %v312_v36, %v311_v19 }
  0xa6   : > { %v1246_v54 = vadd.f32 %v265_v37, %v264_v20  ;;  %v1248_v55 = vadd.f32 %v272_v38, %v271_v21  ;;  %v1250_v56 = vadd.f32 %v279_v39, %v278_v22  ;;  %v1252_v57 = vadd.f32 %v286_v40, %v285_v23 }
  0xa7   : > { %v293_v60 = vrot.slane %v292_v42, 1  ;;  %v300_v61 = vrot.slane %v299_v43, 1  ;;  %v307_v62 = vrot.slane %v306_v44, 1  ;;  %v314_v63 = vrot.slane %v313_v45, 1 }
  0xa8   : > { %v499_v2 = vmul.f32 %v497_v46, %v486_v41  ;;  %v500_v3 = vmul.f32 %v497_v46, %v487_v47  ;;  %v501_v4 = vmul.f32 %v497_v46, %v488_v52  ;;  %v502_v5 = vmul.f32 %v497_v46, %v489_v53 }
  0xa9   : > { %v1258_v6 = vadd.f32 %v293_v60, %v292_v42  ;;  %v1260_v7 = vadd.f32 %v300_v61, %v299_v43  ;;  %v1262_v8 = vadd.f32 %v307_v62, %v306_v44  ;;  %v1264_v9 = vadd.f32 %v314_v63, %v313_v45 }
  0xaa   : > { %v503_v10 = vmul.f32 %v497_v46, %v490_v58  ;;  %v504_v11 = vmul.f32 %v497_v46, %v491_v59  ;;  %v505_v12 = vmul.f32 %v497_v46, %v492_v0  ;;  %v506_v13 = vmul.f32 %v497_v46, %v493_v1 }
  0xab   : > { %v507_v14 = vsel %vm259_vm0, %v499_v2, 0.0  ;;  %v514_v15 = vsel %vm259_vm0, %v500_v3, 0.0  ;;  %v521_v16 = vsel %vm259_vm0, %v501_v4, 0.0  ;;  %v528_v17 = vsel %vm259_vm0, %v502_v5, 0.0 }
  0xac   : > { %v508_v18 = vrot.slane %v507_v14, 4  ;;  %v515_v19 = vrot.slane %v514_v15, 4  ;;  %v522_v20 = vrot.slane %v521_v16, 4  ;;  %v529_v21 = vrot.slane %v528_v17, 4 }
  0xad   : > { %v535_v22 = vsel %vm259_vm0, %v503_v10, 0.0  ;;  %v542_v23 = vsel %vm259_vm0, %v504_v11, 0.0  ;;  %v549_v24 = vsel %vm259_vm0, %v505_v12, 0.0  ;;  %v556_v25 = vsel %vm259_vm0, %v506_v13, 0.0  ;;  %v316_v11 = vld [vmem:[%s1174_s12 + $0x8] sm:$0xff] }
  0xae   : > { %v509_v27 = vadd.f32 %v508_v18, %v507_v14  ;;  %v516_v36 = vadd.f32 %v515_v19, %v514_v15  ;;  %v523_v37 = vadd.f32 %v522_v20, %v521_v16  ;;  %v530_v38 = vadd.f32 %v529_v21, %v528_v17  ;;  %v327_v16 = vpop.permute.xlu0 %326  ;;  %v317_v17 = vld [vmem:[%s1174_s12 + $0x40] sm:$0xff]  ;;  %v318_v18 = vld [vmem:[%s1174_s12 + $0x78] sm:$0xff]  ;;  %v319_v19 = vld [vmem:[%s1174_s12 + $0xb0] sm:$0xff] }
  0xaf   : > { %v536_v39 = vrot.slane %v535_v22, 4  ;;  %v543_v40 = vrot.slane %v542_v23, 4  ;;  %v550_v41 = vrot.slane %v549_v24, 4  ;;  %v557_v42 = vrot.slane %v556_v25, 4 }
  0xb0   : > { %v510_v43 = vrot.slane %v509_v27, 2  ;;  %v517_v44 = vrot.slane %v516_v36, 2  ;;  %v524_v45 = vrot.slane %v523_v37, 2  ;;  %v531_v46 = vrot.slane %v530_v38, 2 }
  0xb1   : > { %v537_v47 = vadd.f32 %v536_v39, %v535_v22  ;;  %v544_v52 = vadd.f32 %v543_v40, %v542_v23  ;;  %v551_v53 = vadd.f32 %v550_v41, %v549_v24  ;;  %v558_v58 = vadd.f32 %v557_v42, %v556_v25  ;;  %v320_v24 = vld [vmem:[%s1174_s12 + $0xe8] sm:$0xff]  ;;  %v321_v25 = vld [vmem:[%s1174_s12 + $0x120] sm:$0xff]  ;;  %v322_v39 = vld [vmem:[%s1174_s12 + $0x158] sm:$0xff] }
  0xb2   : > { %v511_v59 = vadd.f32 %v510_v43, %v509_v27  ;;  %v518_v60 = vadd.f32 %v517_v44, %v516_v36  ;;  %v525_v61 = vadd.f32 %v524_v45, %v523_v37  ;;  %v532_v62 = vadd.f32 %v531_v46, %v530_v38  ;;  %v323_v40 = vld [vmem:[%s1174_s12 + $0x190] sm:$0xff] }
  0xb3   : > { %v538_v63 = vrot.slane %v537_v47, 2  ;;  %v545_v0 = vrot.slane %v544_v52, 2  ;;  %v552_v1 = vrot.slane %v551_v53, 2  ;;  %v559_v2 = vrot.slane %v558_v58, 2 }
  0xb4   : > { %v512_v3 = vrot.slane %v511_v59, 1  ;;  %v519_v4 = vrot.slane %v518_v60, 1  ;;  %v526_v5 = vrot.slane %v525_v61, 1  ;;  %v533_v10 = vrot.slane %v532_v62, 1 }
  0xb5   : > { %v539_v12 = vadd.f32 %v538_v63, %v537_v47  ;;  %v546_v13 = vadd.f32 %v545_v0, %v544_v52  ;;  %v553_v14 = vadd.f32 %v552_v1, %v551_v53  ;;  %v560_v15 = vadd.f32 %v559_v2, %v558_v58 }
  0xb6   : > { %v1278_v20 = vadd.f32 %v512_v3, %v511_v59  ;;  %v1280_v21 = vadd.f32 %v519_v4, %v518_v60  ;;  %v1282_v22 = vadd.f32 %v526_v5, %v525_v61  ;;  %v1284_v23 = vadd.f32 %v533_v10, %v532_v62 }
  0xb7   : > { %v540_v27 = vrot.slane %v539_v12, 1  ;;  %v547_v36 = vrot.slane %v546_v13, 1  ;;  %v554_v37 = vrot.slane %v553_v14, 1  ;;  %v561_v38 = vrot.slane %v560_v15, 1 }
  0xb8   : > { %v329_v41 = vmul.f32 %v327_v16, %v316_v11  ;;  %v330_v42 = vmul.f32 %v327_v16, %v317_v17  ;;  %v331_v43 = vmul.f32 %v327_v16, %v318_v18  ;;  %v332_v44 = vmul.f32 %v327_v16, %v319_v19 }
  0xb9   : > { %v1290_v45 = vadd.f32 %v540_v27, %v539_v12  ;;  %v1292_v46 = vadd.f32 %v547_v36, %v546_v13  ;;  %v1294_v47 = vadd.f32 %v554_v37, %v553_v14  ;;  %v1296_v52 = vadd.f32 %v561_v38, %v560_v15 }
  0xba   : > { %v333_v53 = vmul.f32 %v327_v16, %v320_v24  ;;  %v334_v58 = vmul.f32 %v327_v16, %v321_v25  ;;  %v335_v59 = vmul.f32 %v327_v16, %v322_v39  ;;  %v336_v60 = vmul.f32 %v327_v16, %v323_v40 }
  0xbb   : > { %v337_v61 = vsel %vm259_vm0, %v329_v41, 0.0  ;;  %v344_v62 = vsel %vm259_vm0, %v330_v42, 0.0  ;;  %v351_v63 = vsel %vm259_vm0, %v331_v43, 0.0  ;;  %v358_v0 = vsel %vm259_vm0, %v332_v44, 0.0 }
  0xbc   : > { %v338_v1 = vrot.slane %v337_v61, 4  ;;  %v345_v2 = vrot.slane %v344_v62, 4  ;;  %v352_v3 = vrot.slane %v351_v63, 4  ;;  %v359_v4 = vrot.slane %v358_v0, 4 }
  0xbd   : > { %v365_v5 = vsel %vm259_vm0, %v333_v53, 0.0  ;;  %v372_v10 = vsel %vm259_vm0, %v334_v58, 0.0  ;;  %v379_v11 = vsel %vm259_vm0, %v335_v59, 0.0  ;;  %v386_v12 = vsel %vm259_vm0, %v336_v60, 0.0 }
  0xbe   : > { %v339_v13 = vadd.f32 %v338_v1, %v337_v61  ;;  %v346_v14 = vadd.f32 %v345_v2, %v344_v62  ;;  %v353_v15 = vadd.f32 %v352_v3, %v351_v63  ;;  %v360_v16 = vadd.f32 %v359_v4, %v358_v0 }
  0xbf   : > { %v366_v17 = vrot.slane %v365_v5, 4  ;;  %v373_v18 = vrot.slane %v372_v10, 4  ;;  %v380_v19 = vrot.slane %v379_v11, 4  ;;  %v387_v24 = vrot.slane %v386_v12, 4 }
  0xc0   : > { %v340_v25 = vrot.slane %v339_v13, 2  ;;  %v347_v27 = vrot.slane %v346_v14, 2  ;;  %v354_v36 = vrot.slane %v353_v15, 2  ;;  %v361_v37 = vrot.slane %v360_v16, 2 }
  0xc1   : > { %v367_v38 = vadd.f32 %v366_v17, %v365_v5  ;;  %v374_v39 = vadd.f32 %v373_v18, %v372_v10  ;;  %v381_v40 = vadd.f32 %v380_v19, %v379_v11  ;;  %v388_v41 = vadd.f32 %v387_v24, %v386_v12 }
  0xc2   : > { %v341_v42 = vadd.f32 %v340_v25, %v339_v13  ;;  %v348_v43 = vadd.f32 %v347_v27, %v346_v14  ;;  %v355_v44 = vadd.f32 %v354_v36, %v353_v15  ;;  %v362_v53 = vadd.f32 %v361_v37, %v360_v16  ;;  %v656_v27 = vld [vmem:[%s1174_s12 + $0x28] sm:$0xff] }
  0xc3   : > { %v368_v58 = vrot.slane %v367_v38, 2  ;;  %v375_v59 = vrot.slane %v374_v39, 2  ;;  %v382_v60 = vrot.slane %v381_v40, 2  ;;  %v389_v61 = vrot.slane %v388_v41, 2 }
  0xc4   : > { %v342_v62 = vrot.slane %v341_v42, 1  ;;  %v349_v63 = vrot.slane %v348_v43, 1  ;;  %v356_v0 = vrot.slane %v355_v44, 1  ;;  %v363_v1 = vrot.slane %v362_v53, 1 }
  0xc5   : > { %v369_v2 = vadd.f32 %v368_v58, %v367_v38  ;;  %v376_v3 = vadd.f32 %v375_v59, %v374_v39  ;;  %v383_v4 = vadd.f32 %v382_v60, %v381_v40  ;;  %v390_v5 = vadd.f32 %v389_v61, %v388_v41  ;;  %v667_v40 = vpop.permute.xlu1 %666  ;;  %v657_v41 = vld [vmem:[%s1174_s12 + $0x60] sm:$0xff]  ;;  %v662_v61 = vld [vmem:[%s1174_s12 + $0x178] sm:$0xff] }
  0xc6   : > { %v343_v10 = vadd.f32 %v342_v62, %v341_v42  ;;  %v350_v11 = vadd.f32 %v349_v63, %v348_v43  ;;  %v357_v12 = vadd.f32 %v356_v0, %v355_v44  ;;  %v364_v13 = vadd.f32 %v363_v1, %v362_v53  ;;  %v658_v42 = vld [vmem:[%s1174_s12 + $0x98] sm:$0xff]  ;;  %v659_v43 = vld [vmem:[%s1174_s12 + $0xd0] sm:$0xff]  ;;  %v660_v44 = vld [vmem:[%s1174_s12 + $0x108] sm:$0xff] }
  0xc7   : > { %v370_v14 = vrot.slane %v369_v2, 1  ;;  %v377_v15 = vrot.slane %v376_v3, 1  ;;  %v384_v16 = vrot.slane %v383_v4, 1  ;;  %v391_v17 = vrot.slane %v390_v5, 1  ;;  %v663_v62 = vld [vmem:[%s1174_s12 + $0x1b0] sm:$0xff] }
  0xc8   : > { %v393_v18 = vadd.f32 %v343_v10, %v1246_v54  ;;  %v394_v19 = vadd.f32 %v350_v11, %v1248_v55  ;;  %v395_v24 = vadd.f32 %v357_v12, %v1250_v56  ;;  %v396_v25 = vadd.f32 %v364_v13, %v1252_v57 }
  0xc9   : > { %v371_v36 = vadd.f32 %v370_v14, %v369_v2  ;;  %v378_v37 = vadd.f32 %v377_v15, %v376_v3  ;;  %v385_v38 = vadd.f32 %v384_v16, %v383_v4  ;;  %v392_v39 = vadd.f32 %v391_v17, %v390_v5 }
  0xca   : > { %v1315_v54 = vadd.f32 %v1214_v28, %v393_v18  ;;  %v1318_v55 = vadd.f32 %v1216_v30, %v394_v19  ;;  %v1321_v56 = vadd.f32 %v1218_v34, %v395_v24  ;;  %v1324_v57 = vadd.f32 %v1220_v35, %v396_v25  ;;  %v661_v28 = vld [vmem:[%s1174_s12 + $0x140] sm:$0xff] }
  0xcb   : > { %v397_v53 = vadd.f32 %v371_v36, %v1258_v6  ;;  %v398_v58 = vadd.f32 %v378_v37, %v1260_v7  ;;  %v399_v59 = vadd.f32 %v385_v38, %v1262_v8  ;;  %v400_v60 = vadd.f32 %v392_v39, %v1264_v9 }
  0xcc   : > { %v669_v30 = vmul.f32 %v667_v40, %v656_v27  ;;  %v670_v63 = vmul.f32 %v667_v40, %v657_v41  ;;  %v671_v0 = vmul.f32 %v667_v40, %v658_v42  ;;  %v672_v34 = vmul.f32 %v667_v40, %v659_v43 }
  0xcd   : > { %v1335_v1 = vadd.f32 %v1226_v48, %v397_v53  ;;  %v1338_v35 = vadd.f32 %v1228_v49, %v398_v58  ;;  %v1341_v6 = vadd.f32 %v1230_v50, %v399_v59  ;;  %v1344_v7 = vadd.f32 %v1232_v51, %v400_v60 }
  0xce   : > { %v673_v8 = vmul.f32 %v667_v40, %v660_v44  ;;  %v674_v9 = vmul.f32 %v667_v40, %v661_v28  ;;  %v675_v2 = vmul.f32 %v667_v40, %v662_v61  ;;  %v676_v3 = vmul.f32 %v667_v40, %v663_v62 }
  0xcf   : > { %v677_v4 = vsel %vm259_vm0, %v669_v30, 0.0  ;;  %v684_v5 = vsel %vm259_vm0, %v670_v63, 0.0  ;;  %v691_v48 = vsel %vm259_vm0, %v671_v0, 0.0  ;;  %v698_v10 = vsel %vm259_vm0, %v672_v34, 0.0 }
  0xd0   : > { %v678_v49 = vrot.slane %v677_v4, 4  ;;  %v685_v11 = vrot.slane %v684_v5, 4  ;;  %v692_v12 = vrot.slane %v691_v48, 4  ;;  %v699_v50 = vrot.slane %v698_v10, 4 }
  0xd1   : > { %v705_v13 = vsel %vm259_vm0, %v673_v8, 0.0  ;;  %v712_v51 = vsel %vm259_vm0, %v674_v9, 0.0  ;;  %v719_v14 = vsel %vm259_vm0, %v675_v2, 0.0  ;;  %v726_v15 = vsel %vm259_vm0, %v676_v3, 0.0  ;;  %v571_v9 = vld [vmem:[%s1174_s12 + $0x20] sm:$0xff] }
  0xd2   : > { %v679_v16 = vadd.f32 %v678_v49, %v677_v4  ;;  %v686_v17 = vadd.f32 %v685_v11, %v684_v5  ;;  %v693_v18 = vadd.f32 %v692_v12, %v691_v48  ;;  %v700_v19 = vadd.f32 %v699_v50, %v698_v10  ;;  %v582_v48 = vpop.permute.xlu0 %581  ;;  %v572_v10 = vld [vmem:[%s1174_s12 + $0x58] sm:$0xff]  ;;  %v573_v49 = vld [vmem:[%s1174_s12 + $0x90] sm:$0xff]  ;;  %v574_v11 = vld [vmem:[%s1174_s12 + $0xc8] sm:$0xff] }
  0xd3   : > { %v706_v24 = vrot.slane %v705_v13, 4  ;;  %v713_v25 = vrot.slane %v712_v51, 4  ;;  %v720_v27 = vrot.slane %v719_v14, 4  ;;  %v727_v36 = vrot.slane %v726_v15, 4 }
  0xd4   : > { %v680_v37 = vrot.slane %v679_v16, 2  ;;  %v687_v38 = vrot.slane %v686_v17, 2  ;;  %v694_v39 = vrot.slane %v693_v18, 2  ;;  %v701_v40 = vrot.slane %v700_v19, 2 }
  0xd5   : > { %v707_v41 = vadd.f32 %v706_v24, %v705_v13  ;;  %v714_v42 = vadd.f32 %v713_v25, %v712_v51  ;;  %v721_v43 = vadd.f32 %v720_v27, %v719_v14  ;;  %v728_v44 = vadd.f32 %v727_v36, %v726_v15  ;;  %v575_v14 = vld [vmem:[%s1174_s12 + $0x100] sm:$0xff]  ;;  %v576_v15 = vld [vmem:[%s1174_s12 + $0x138] sm:$0xff]  ;;  %v577_v24 = vld [vmem:[%s1174_s12 + $0x170] sm:$0xff] }
  0xd6   : > { %v681_v53 = vadd.f32 %v680_v37, %v679_v16  ;;  %v688_v58 = vadd.f32 %v687_v38, %v686_v17  ;;  %v695_v59 = vadd.f32 %v694_v39, %v693_v18  ;;  %v702_v60 = vadd.f32 %v701_v40, %v700_v19  ;;  %v578_v25 = vld [vmem:[%s1174_s12 + $0x1a8] sm:$0xff] }
  0xd7   : > { %v708_v28 = vrot.slane %v707_v41, 2  ;;  %v715_v61 = vrot.slane %v714_v42, 2  ;;  %v722_v62 = vrot.slane %v721_v43, 2  ;;  %v729_v30 = vrot.slane %v728_v44, 2 }
  0xd8   : > { %v682_v63 = vrot.slane %v681_v53, 1  ;;  %v689_v0 = vrot.slane %v688_v58, 1  ;;  %v696_v34 = vrot.slane %v695_v59, 1  ;;  %v703_v8 = vrot.slane %v702_v60, 1 }
  0xd9   : > { %v709_v2 = vadd.f32 %v708_v28, %v707_v41  ;;  %v716_v3 = vadd.f32 %v715_v61, %v714_v42  ;;  %v723_v4 = vadd.f32 %v722_v62, %v721_v43  ;;  %v730_v5 = vadd.f32 %v729_v30, %v728_v44 }
  0xda   : > { %v1358_v12 = vadd.f32 %v682_v63, %v681_v53  ;;  %v1360_v50 = vadd.f32 %v689_v0, %v688_v58  ;;  %v1362_v13 = vadd.f32 %v696_v34, %v695_v59  ;;  %v1364_v51 = vadd.f32 %v703_v8, %v702_v60 }
  0xdb   : > { %v710_v16 = vrot.slane %v709_v2, 1  ;;  %v717_v17 = vrot.slane %v716_v3, 1  ;;  %v724_v18 = vrot.slane %v723_v4, 1  ;;  %v731_v19 = vrot.slane %v730_v5, 1 }
  0xdc   : > { %v584_v27 = vmul.f32 %v582_v48, %v571_v9  ;;  %v585_v36 = vmul.f32 %v582_v48, %v572_v10  ;;  %v586_v37 = vmul.f32 %v582_v48, %v573_v49  ;;  %v587_v38 = vmul.f32 %v582_v48, %v574_v11 }
  0xdd   : > { %v1370_v39 = vadd.f32 %v710_v16, %v709_v2  ;;  %v1372_v40 = vadd.f32 %v717_v17, %v716_v3  ;;  %v1374_v41 = vadd.f32 %v724_v18, %v723_v4  ;;  %v1376_v42 = vadd.f32 %v731_v19, %v730_v5 }
  0xde   : > { %v588_v43 = vmul.f32 %v582_v48, %v575_v14  ;;  %v589_v44 = vmul.f32 %v582_v48, %v576_v15  ;;  %v590_v53 = vmul.f32 %v582_v48, %v577_v24  ;;  %v591_v58 = vmul.f32 %v582_v48, %v578_v25 }
  0xdf   : > { %v592_v59 = vsel %vm259_vm0, %v584_v27, 0.0  ;;  %v599_v60 = vsel %vm259_vm0, %v585_v36, 0.0  ;;  %v606_v28 = vsel %vm259_vm0, %v586_v37, 0.0  ;;  %v613_v61 = vsel %vm259_vm0, %v587_v38, 0.0 }
  0xe0   : > { %v593_v62 = vrot.slane %v592_v59, 4  ;;  %v600_v30 = vrot.slane %v599_v60, 4  ;;  %v607_v63 = vrot.slane %v606_v28, 4  ;;  %v614_v0 = vrot.slane %v613_v61, 4 }
  0xe1   : > { %v620_v34 = vsel %vm259_vm0, %v588_v43, 0.0  ;;  %v627_v8 = vsel %vm259_vm0, %v589_v44, 0.0  ;;  %v634_v9 = vsel %vm259_vm0, %v590_v53, 0.0  ;;  %v641_v2 = vsel %vm259_vm0, %v591_v58, 0.0 }
  0xe2   : > { %v594_v3 = vadd.f32 %v593_v62, %v592_v59  ;;  %v601_v4 = vadd.f32 %v600_v30, %v599_v60  ;;  %v608_v5 = vadd.f32 %v607_v63, %v606_v28  ;;  %v615_v48 = vadd.f32 %v614_v0, %v613_v61 }
  0xe3   : > { %v621_v10 = vrot.slane %v620_v34, 4  ;;  %v628_v49 = vrot.slane %v627_v8, 4  ;;  %v635_v11 = vrot.slane %v634_v9, 4  ;;  %v642_v14 = vrot.slane %v641_v2, 4 }
  0xe4   : > { %v595_v15 = vrot.slane %v594_v3, 2  ;;  %v602_v16 = vrot.slane %v601_v4, 2  ;;  %v609_v17 = vrot.slane %v608_v5, 2  ;;  %v616_v18 = vrot.slane %v615_v48, 2 }
  0xe5   : > { %v622_v19 = vadd.f32 %v621_v10, %v620_v34  ;;  %v629_v24 = vadd.f32 %v628_v49, %v627_v8  ;;  %v636_v25 = vadd.f32 %v635_v11, %v634_v9  ;;  %v643_v27 = vadd.f32 %v642_v14, %v641_v2 }
  0xe6   : > { %v596_v36 = vadd.f32 %v595_v15, %v594_v3  ;;  %v603_v37 = vadd.f32 %v602_v16, %v601_v4  ;;  %v610_v38 = vadd.f32 %v609_v17, %v608_v5  ;;  %v617_v43 = vadd.f32 %v616_v18, %v615_v48 }
  0xe7   : > { %v623_v44 = vrot.slane %v622_v19, 2  ;;  %v630_v53 = vrot.slane %v629_v24, 2  ;;  %v637_v58 = vrot.slane %v636_v25, 2  ;;  %v644_v59 = vrot.slane %v643_v27, 2 }
  0xe8   : > { %v597_v60 = vrot.slane %v596_v36, 1  ;;  %v604_v28 = vrot.slane %v603_v37, 1  ;;  %v611_v61 = vrot.slane %v610_v38, 1  ;;  %v618_v62 = vrot.slane %v617_v43, 1 }
  0xe9   : > { %v624_v30 = vadd.f32 %v623_v44, %v622_v19  ;;  %v631_v63 = vadd.f32 %v630_v53, %v629_v24  ;;  %v638_v0 = vadd.f32 %v637_v58, %v636_v25  ;;  %v645_v32 = vadd.f32 %v644_v59, %v643_v27  ;;  %v743_v25 = vld [vmem:[%s1174_s12 + $0xa0] sm:$0x3]  ;;  %v744_v27 = vld [vmem:[%s1174_s12 + $0xd8] sm:$0x3] }
  0xea   : > { %v598_v34 = vadd.f32 %v597_v60, %v596_v36  ;;  %v605_v8 = vadd.f32 %v604_v28, %v603_v37  ;;  %v612_v9 = vadd.f32 %v611_v61, %v610_v38  ;;  %v619_v2 = vadd.f32 %v618_v62, %v617_v43  ;;  %v746_v37 = vld [vmem:[%s1174_s12 + $0x148] sm:$0x3]  ;;  %v747_v38 = vld [vmem:[%s1174_s12 + $0x180] sm:$0x3]  ;;  %v748_v43 = vld [vmem:[%s1174_s12 + $0x1b8] sm:$0x3] }
  0xeb   : > { %v625_v3 = vrot.slane %v624_v30, 1  ;;  %v632_v4 = vrot.slane %v631_v63, 1  ;;  %v639_v5 = vrot.slane %v638_v0, 1  ;;  %v646_v48 = vrot.slane %v645_v32, 1 }
  0xec   : > { %v563_v10 = vadd.f32 %v1278_v20, %v1315_v54  ;;  %v564_v49 = vadd.f32 %v1280_v21, %v1318_v55  ;;  %v565_v11 = vadd.f32 %v1282_v22, %v1321_v56  ;;  %v566_v14 = vadd.f32 %v1284_v23, %v1324_v57  ;;  %v741_v56 = vld [vmem:[%s1174_s12 + $0x30] sm:$0x3]  ;;  %v752_v57 = vpop.permute.xlu0 %751 }
  0xed   : > { %v626_v15 = vadd.f32 %v625_v3, %v624_v30  ;;  %v633_v16 = vadd.f32 %v632_v4, %v631_v63  ;;  %v640_v17 = vadd.f32 %v639_v5, %v638_v0  ;;  %v647_v18 = vadd.f32 %v646_v48, %v645_v32 }
  0xee   : > { %v567_v19 = vadd.f32 %v1290_v45, %v1335_v1  ;;  %v568_v20 = vadd.f32 %v1292_v46, %v1338_v35  ;;  %v569_v21 = vadd.f32 %v1294_v47, %v1341_v6  ;;  %v570_v22 = vadd.f32 %v1296_v52, %v1344_v7  ;;  %v742_v45 = vld [vmem:[%s1174_s12 + $0x68] sm:$0x3]  ;;  %v745_v47 = vld [vmem:[%s1174_s12 + $0x110] sm:$0x3] }
  0xef   : > { %v648_v23 = vadd.f32 %v598_v34, %v563_v10  ;;  %v649_v54 = vadd.f32 %v605_v8, %v564_v49  ;;  %v650_v55 = vadd.f32 %v612_v9, %v565_v11  ;;  %v651_v32 = vadd.f32 %v619_v2, %v566_v14 }
  0xf0   : > { %v652_v1 = vadd.f32 %v626_v15, %v567_v19  ;;  %v653_v24 = vadd.f32 %v633_v16, %v568_v20  ;;  %v654_v46 = vadd.f32 %v640_v17, %v569_v21  ;;  %v655_v35 = vadd.f32 %v647_v18, %v570_v22 }
  0xf1   : > { %v1408_v6 = vadd.f32 %v1358_v12, %v648_v23  ;;  %v1411_v52 = vadd.f32 %v1360_v50, %v649_v54  ;;  %v1414_v7 = vadd.f32 %v1362_v13, %v650_v55  ;;  %v1417_v36 = vadd.f32 %v1364_v51, %v651_v32 }
  0xf2   : > { %v1423_v44 = vadd.f32 %v1370_v39, %v652_v1  ;;  %v1426_v53 = vadd.f32 %v1372_v40, %v653_v24  ;;  %v1429_v12 = vadd.f32 %v1374_v41, %v654_v46  ;;  %v1432_v50 = vadd.f32 %v1376_v42, %v655_v35 }
  0xf3   : > { %v754_v13 = vmul.f32 %v752_v57, %v741_v56  ;;  %v755_v58 = vmul.f32 %v752_v57, %v742_v45  ;;  %v756_v59 = vmul.f32 %v752_v57, %v743_v25  ;;  %v757_v51 = vmul.f32 %v752_v57, %v744_v27 }
  0xf4   : > { %v758_v60 = vmul.f32 %v752_v57, %v745_v47  ;;  %v759_v28 = vmul.f32 %v752_v57, %v746_v37  ;;  %v760_v61 = vmul.f32 %v752_v57, %v747_v38  ;;  %v761_v62 = vmul.f32 %v752_v57, %v748_v43 }
  0xf5   : > { %v763_v39 = vsel %vm762_vm1, %v754_v13, 0.0  ;;  %v770_v30 = vsel %vm762_vm1, %v755_v58, 0.0  ;;  %v777_v40 = vsel %vm762_vm1, %v756_v59, 0.0  ;;  %v784_v41 = vsel %vm762_vm1, %v757_v51, 0.0 }
  0xf6   : > { %v764_v63 = vrot.slane %v763_v39, 4  ;;  %v771_v0 = vrot.slane %v770_v30, 4  ;;  %v778_v42 = vrot.slane %v777_v40, 4  ;;  %v785_v34 = vrot.slane %v784_v41, 4 }
  0xf7   : > { %v791_v8 = vsel %vm762_vm1, %v758_v60, 0.0  ;;  %v798_v9 = vsel %vm762_vm1, %v759_v28, 0.0  ;;  %v805_v2 = vsel %vm762_vm1, %v760_v61, 0.0  ;;  %v812_v3 = vsel %vm762_vm1, %v761_v62, 0.0 }
  0xf8   : > { %v765_v4 = vadd.f32 %v764_v63, %v763_v39  ;;  %v772_v5 = vadd.f32 %v771_v0, %v770_v30  ;;  %v779_v48 = vadd.f32 %v778_v42, %v777_v40  ;;  %v786_v10 = vadd.f32 %v785_v34, %v784_v41 }
  0xf9   : > { %v792_v49 = vrot.slane %v791_v8, 4  ;;  %v799_v11 = vrot.slane %v798_v9, 4  ;;  %v806_v14 = vrot.slane %v805_v2, 4  ;;  %v813_v15 = vrot.slane %v812_v3, 4 }
  0xfa   : > { %v766_v16 = vrot.slane %v765_v4, 2  ;;  %v773_v17 = vrot.slane %v772_v5, 2  ;;  %v780_v18 = vrot.slane %v779_v48, 2  ;;  %v787_v19 = vrot.slane %v786_v10, 2 }
  0xfb   : > { %v793_v20 = vadd.f32 %v792_v49, %v791_v8  ;;  %v800_v21 = vadd.f32 %v799_v11, %v798_v9  ;;  %v807_v22 = vadd.f32 %v806_v14, %v805_v2  ;;  %v814_v23 = vadd.f32 %v813_v15, %v812_v3 }
  0xfc   : > { %v767_v54 = vadd.f32 %v766_v16, %v765_v4  ;;  %v774_v55 = vadd.f32 %v773_v17, %v772_v5  ;;  %v781_v32 = vadd.f32 %v780_v18, %v779_v48  ;;  %v788_v56 = vadd.f32 %v787_v19, %v786_v10 }
  0xfd   : > { %v794_v45 = vrot.slane %v793_v20, 2  ;;  %v801_v57 = vrot.slane %v800_v21, 2  ;;  %v808_v1 = vrot.slane %v807_v22, 2  ;;  %v815_v24 = vrot.slane %v814_v23, 2 }
  0xfe   : > { %v768_v46 = vrot.slane %v767_v54, 1  ;;  %v775_v35 = vrot.slane %v774_v55, 1  ;;  %v782_v25 = vrot.slane %v781_v32, 1  ;;  %v789_v27 = vrot.slane %v788_v56, 1 }
  0xff   : > { %v795_v47 = vadd.f32 %v794_v45, %v793_v20  ;;  %v802_v37 = vadd.f32 %v801_v57, %v800_v21  ;;  %v809_v38 = vadd.f32 %v808_v1, %v807_v22  ;;  %v816_v43 = vadd.f32 %v815_v24, %v814_v23 }
 0x100   : > { %v769_v13 = vadd.f32 %v768_v46, %v767_v54  ;;  %v776_v58 = vadd.f32 %v775_v35, %v774_v55  ;;  %v783_v59 = vadd.f32 %v782_v25, %v781_v32  ;;  %v790_v51 = vadd.f32 %v789_v27, %v788_v56  ;;  %v1095_v54 = vld [vmem:[%s1179_s15] sm:$0xff] }
 0x101   : > { %v796_v60 = vrot.slane %v795_v47, 1  ;;  %v803_v28 = vrot.slane %v802_v37, 1  ;;  %v810_v61 = vrot.slane %v809_v38, 1  ;;  %v817_v62 = vrot.slane %v816_v43, 1 }
 0x102   : > { %v819_v39 = vadd.f32 %v769_v13, %v1408_v6  ;;  %v820_v30 = vadd.f32 %v776_v58, %v1411_v52  ;;  %v821_v40 = vadd.f32 %v783_v59, %v1414_v7  ;;  %v822_v41 = vadd.f32 %v790_v51, %v1417_v36 }
 0x103   : > { %v797_v63 = vadd.f32 %v796_v60, %v795_v47  ;;  %v804_v0 = vadd.f32 %v803_v28, %v802_v37  ;;  %v811_v42 = vadd.f32 %v810_v61, %v809_v38  ;;  %v818_v34 = vadd.f32 %v817_v62, %v816_v43 }
 0x104   : > { %v828_v6 = vadd.f32 %v1194_v31, %v819_v39  ;;  %v829_v52 = vadd.f32 %v1194_v31, %v820_v30  ;;  %v830_v7 = vadd.f32 %v1194_v31, %v821_v40  ;;  %v831_v36 = vadd.f32 %v1194_v31, %v822_v41 }
 0x105   : > { %v823_v8 = vadd.f32 %v797_v63, %v1423_v44  ;;  %v824_v9 = vadd.f32 %v804_v0, %v1426_v53  ;;  %v825_v2 = vadd.f32 %v811_v42, %v1429_v12  ;;  %v826_v3 = vadd.f32 %v818_v34, %v1432_v50 }
 0x106   : > { %v1544_v4 = vcombine.high %v1192_v29, %v1192_v29  ;;  %v852_v48 = vcombine.high %v1200_v33, %v1200_v33  ;;  %v860_v10 = vrot.slane %v1200_v33, %v1187_v26  ;;  %v912_v44 = vsel %vm911_vm3, %v829_v52, %v828_v6  ;;  %993 = vst.msk [vmem:[%s1450_s20 + $0x2] sm:$0x1] %vm894_vm2, %v828_v6 }
 0x107   : > { %994 = vst.msk [vmem:[%s1450_s20 + $0x6] sm:$0x1] %vm894_vm2, %v829_v52  ;;  %995 = vst.msk [vmem:[%s1450_s20 + $0xa] sm:$0x1] %vm894_vm2, %v830_v7  ;;  %v832_v29 = vadd.f32 %v1194_v31, %v823_v8  ;;  %v833_v53 = vadd.f32 %v1194_v31, %v824_v9  ;;  %v834_v33 = vadd.f32 %v1194_v31, %v825_v2 }
 0x108   : > { %v851_v5 = vrot.slane %v1544_v4, %v1187_v26  ;;  %996 = vst.msk [vmem:[%s1450_s20 + $0xe] sm:$0x1] %vm894_vm2, %v831_v36  ;;  %v835_v12 = vadd.f32 %v1194_v31, %v826_v3  ;;  %v874_v11 = vrot.slane %v852_v48, %v1187_v26  ;;  %v882_v14 = vcombine.high %v860_v10, %v860_v10 }
 0x109   : > { %895 = vst.msk [vmem:[%s1450_s20] sm:$0x1] %vm894_vm2, %v860_v10  ;;  %v914_v15 = vsel %vm913_vm4, %v830_v7, %v912_v44  ;;  %997 = vst.msk [vmem:[%s1450_s20 + $0x12] sm:$0x1] %vm894_vm2, %v832_v29 }
 0x10a   : > { %v853_v50 = vcombine.high %v851_v5, %v851_v5  ;;  %v867_v49 = vrot.slane %v851_v5, %v1187_v26  ;;  %998 = vst.msk [vmem:[%s1450_s20 + $0x16] sm:$0x1] %vm894_vm2, %v833_v53  ;;  %999 = vst.msk [vmem:[%s1450_s20 + $0x1a] sm:$0x1] %vm894_vm2, %v834_v33  ;;  %v884_v17 = vcombine.high %v874_v11, %v874_v11 }
 0x10b   : > { %1000 = vst.msk [vmem:[%s1450_s20 + $0x1e] sm:$0x1] %vm894_vm2, %v835_v12  ;;  %896 = vst.msk [vmem:[%s1450_s20 + $0x4] sm:$0x1] %vm894_vm2, %v874_v11  ;;  %v916_v18 = vsel %vm915_vm5, %v831_v36, %v914_v15 }
 0x10c   : > { %v881_v31 = vrot.slane %v853_v50, %v1187_v26  ;;  %v883_v16 = vcombine.high %v867_v49, %v867_v49  ;;  %897 = vst.msk [vmem:[%s1450_s20 + $0x8] sm:$0x1] %vm894_vm2, %v882_v14  ;;  %899 = vst.msk [vmem:[%s1450_s20 + $0x10] sm:$0x1] %vm894_vm2, %v867_v49  ;;  %v918_v19 = vsel %vm917_vm6, %v832_v29, %v916_v18 }
 0x10d   : > { %898 = vst.msk [vmem:[%s1450_s20 + $0xc] sm:$0x1] %vm894_vm2, %v884_v17  ;;  %v920_v21 = vsel %vm919_vm7, %v833_v53, %v918_v19 }
 0x10e   : > { %v885_v20 = vcombine.high %v881_v31, %v881_v31  ;;  %900 = vst.msk [vmem:[%s1450_s20 + $0x14] sm:$0x1] %vm894_vm2, %v881_v31  ;;  %901 = vst.msk [vmem:[%s1450_s20 + $0x18] sm:$0x1] %vm894_vm2, %v883_v16  ;;  %v922_v22 = vsel %vm921_vm8, %v834_v33, %v920_v21 }
 0x10f   : > { %v924_v23 = vsel %vm923_vm9, %v835_v12, %v922_v22 }
 0x110   : > { %902 = vst.msk [vmem:[%s1450_s20 + $0x1c] sm:$0x1] %vm894_vm2, %v885_v20  ;;  %v926_v55 = vmul.f32 %v1095_v54, %v924_v23 }
 0x112   : > { %v928_v32 = vcombine.high %v926_v55, %v926_v55  ;;  %v935_v56 = vrot.slane %v926_v55, %v1187_v26 }
 0x114   : > { %v942_v45 = vrot.slane %v928_v32, %v1187_v26  ;;  %v943_v57 = vcombine.high %v935_v56, %v935_v56  ;;  %v951_v1 = vrot.slane %v935_v56, %v1187_v26 }
 0x116   : > { %v944_v24 = vcombine.high %v942_v45, %v942_v45  ;;  %v958_v46 = vrot.slane %v942_v45, %v1187_v26  ;;  %v965_v35 = vrot.slane %v943_v57, %v1187_v26  ;;  %v973_v25 = vcombine.high %v951_v1, %v951_v1  ;;  %985 = vst.msk [vmem:[%s1450_s20 + $0x1] sm:$0x1] %vm894_vm2, %v951_v1 }
 0x118   : > { %v972_v27 = vrot.slane %v944_v24, %v1187_v26  ;;  %v974_v47 = vcombine.high %v958_v46, %v958_v46  ;;  %v975_v37 = vcombine.high %v965_v35, %v965_v35  ;;  %986 = vst.msk [vmem:[%s1450_s20 + $0x5] sm:$0x1] %vm894_vm2, %v965_v35  ;;  %987 = vst.msk [vmem:[%s1450_s20 + $0x9] sm:$0x1] %vm894_vm2, %v973_v25 }
 0x119   : > { %989 = vst.msk [vmem:[%s1450_s20 + $0x11] sm:$0x1] %vm894_vm2, %v958_v46 }
 0x11a   : > { %v976_v38 = vcombine.high %v972_v27, %v972_v27  ;;  %988 = vst.msk [vmem:[%s1450_s20 + $0xd] sm:$0x1] %vm894_vm2, %v975_v37  ;;  %990 = vst.msk [vmem:[%s1450_s20 + $0x15] sm:$0x1] %vm894_vm2, %v972_v27 }
 0x11b   : > { %991 = vst.msk [vmem:[%s1450_s20 + $0x19] sm:$0x1] %vm894_vm2, %v974_v47 }
 0x11c   : > { %992 = vst.msk [vmem:[%s1450_s20 + $0x1d] sm:$0x1] %vm894_vm2, %v976_v38 }
 0x11d PF: > { %s15_s17 = sadd.s32 1, %s1102_s17  }
 0x11e   : > { %p12_p5 = scmp.ge.s32.totalorder %s15_s17, 4  }
 0x120   :  { %14 = sbr.rel (!%p12_p5) target bundleno = 2 (0x2), region = 69 }

</bundles_post_ra>
